<compile_context>
chip_gen: v7x
topology: tpu7x:2x2x1
jax: 0.10.0
libtpu: 0.0.40
codegen_flags: <defaults>
</compile_context>

<pallas_src>
import functools

import jax
import jax.numpy as jnp
from jax import lax
from jax.experimental import pallas as pl
from jax.experimental.pallas import tpu as pltpu


# ---------------------------------------------------------------------------
# Pallas kernels
# ---------------------------------------------------------------------------
def _conv_phase_kernel(x_ref, w_ref, conv_ref, stats_ref):
    """One (batch, phase) tile of the polyphase transposed convolution.

    x_ref:     (T2C, SP)   bf16  im2col patch: taps*Cin on sublanes, spatial on lanes
    w_ref:     (Cout, T2C) bf16  per-phase flipped weight (transposed)
    conv_ref:  (Cout, SP)  f32   raw conv output, lane-dense
    stats_ref: (Cout, 2)   f32   per-tile per-channel [sum, sum_of_squares]
    """
    acc = jnp.dot(w_ref[...], x_ref[...], preferred_element_type=jnp.float32)
    conv_ref[...] = acc
    s1 = jnp.sum(acc, axis=1, keepdims=True)           # (Cout, 1)  XLU reduce
    s2 = jnp.sum(acc * acc, axis=1, keepdims=True)      # (Cout, 1)
    stats_ref[...] = jnp.concatenate([s1, s2], axis=1)  # (Cout, 2)


def _affine_act_kernel(y_ref, scale_ref, shift_ref, out_ref, *, activation,
                       neg_slope):
    """Fused per-channel affine (BatchNorm or bias) + optional LeakyReLU."""
    z = y_ref[...] * scale_ref[...] + shift_ref[...]     # (Cout, SP) * (Cout, 1)
    if activation:
        z = jnp.where(z > 0, z, neg_slope * z)
    out_ref[...] = z


# ---------------------------------------------------------------------------
# Wrapper
# ---------------------------------------------------------------------------
def deconv2d_norm(x_nchw, weight, bias, gamma, beta, *, stride=2, padding=1,
                  output_padding=0, dilation=1, batch_norm=True,
                  activation=True, eps=1e-5, neg_slope=0.1):
    """Forward of Deconv2DNorm. x: (N,Cin,H,W); weight: (Cin,Cout,KH,KW)."""
    N, Cin, H, W = x_nchw.shape
    Cin_w, Cout, KH, KW = weight.shape
    assert Cin_w == Cin and KH == KW
    K = KH
    s = stride
    # TODO(synk): dilation > 1 is not supported by this polyphase path.
    assert dilation == 1
    p_lo = (K - 1) - padding
    assert p_lo >= 0, "padding larger than kernel extent is unsupported"

    OH = (H - 1) * s - 2 * padding + (K - 1) + output_padding + 1
    OW = (W - 1) * s - 2 * padding + (K - 1) + output_padding + 1
    assert OH % s == 0 and OW % s == 0, "polyphase path needs OH, OW % stride == 0"
    OHp, OWp = OH // s, OW // s
    SP = OHp * OWp            # spatial size of one phase (lane axis)
    P = s * s                 # number of sub-pixel phases
    Tm = -(-K // s)           # kernel taps per dim touching a given phase
    T2C = Tm * Tm * Cin       # contraction depth of the single matmul

    # ---- plain-JAX glue: polyphase im2col (layout plumbing only) -----------
    # spatially flipped weight: w_f[kh, kw, ci, co]
    w_f = jnp.transpose(weight[:, :, ::-1, ::-1], (2, 3, 0, 1))

    offs = [-((p_lo - r) // s) for r in range(s)]   # input offset per phase
    ths = [(p_lo - r) % s for r in range(s)]        # first kernel tap per phase
    pad_t = max(0, -min(offs))
    pad_b = max(0, max(offs) + (Tm - 1) + (OHp - 1) - (H - 1))
    pad_l = max(0, -min(offs))
    pad_r = max(0, max(offs) + (Tm - 1) + (OWp - 1) - (W - 1))
    x_pad = jnp.pad(x_nchw, ((0, 0), (0, 0), (pad_t, pad_b), (pad_l, pad_r)))

    x_phases, w_phases = [], []
    for rh in range(s):
        for rw in range(s):
            taps_x, taps_w = [], []
            for mh in range(Tm):
                for mw in range(Tm):
                    kh = ths[rh] + s * mh
                    kw = ths[rw] + s * mw
                    r0 = pad_t + offs[rh] + mh
                    c0 = pad_l + offs[rw] + mw
                    taps_x.append(x_pad[:, :, r0:r0 + OHp, c0:c0 + OWp])
                    if kh < K and kw < K:
                        taps_w.append(w_f[kh, kw])               # (Cin, Cout)
                    else:  # padded (inactive) tap
                        taps_w.append(jnp.zeros((Cin, Cout), w_f.dtype))
            xc = jnp.stack(taps_x, axis=1).reshape(N, T2C, SP)
            wc = jnp.concatenate(taps_w, axis=0)                  # (T2C, Cout)
            x_phases.append(xc)
            w_phases.append(wc.T)                                 # (Cout, T2C)
    x_col = jnp.stack(x_phases, axis=1).astype(jnp.bfloat16)      # (N,P,T2C,SP)
    w_col = jnp.stack(w_phases, axis=0).astype(jnp.bfloat16)      # (P,Cout,T2C)

    cparams = pltpu.CompilerParams(
        dimension_semantics=("parallel", "parallel"),
        vmem_limit_bytes=32 * 1024 * 1024)

    # ---- pass 1: conv matmul + per-tile channel stats -----------------------
    conv, stats = pl.pallas_call(
        _conv_phase_kernel,
        grid=(N, P),
        in_specs=[
            pl.BlockSpec((None, None, T2C, SP), lambda n, p: (n, p, 0, 0)),
            pl.BlockSpec((None, Cout, T2C), lambda n, p: (p, 0, 0)),
        ],
        out_specs=(
            pl.BlockSpec((None, None, Cout, SP), lambda n, p: (n, p, 0, 0)),
            pl.BlockSpec((None, None, Cout, 2), lambda n, p: (n, p, 0, 0)),
        ),
        out_shape=(
            jax.ShapeDtypeStruct((N, P, Cout, SP), jnp.float32),
            jax.ShapeDtypeStruct((N, P, Cout, 2), jnp.float32),
        ),
        compiler_params=cparams,
    )(x_col, w_col)

    # ---- per-channel scale/shift (Cout scalars; plain JAX) ------------------
    if batch_norm:
        cnt = float(N * OH * OW)
        ssum = jnp.sum(stats[..., 0], axis=(0, 1))
        ssq = jnp.sum(stats[..., 1], axis=(0, 1))
        mean = ssum / cnt
        var = ssq / cnt - mean * mean            # biased, PyTorch training fwd
        scale = gamma.astype(jnp.float32) * lax.rsqrt(var + eps)
        shift = beta.astype(jnp.float32) - mean * scale
        # ConvTranspose2d bias is exactly cancelled by the mean subtraction.
    else:
        scale = jnp.ones((Cout,), jnp.float32)
        shift = bias.astype(jnp.float32)
    scale2 = scale.reshape(Cout, 1)
    shift2 = shift.reshape(Cout, 1)

    # ---- pass 2: fused BatchNorm/bias affine + LeakyReLU --------------------
    out_ph = pl.pallas_call(
        functools.partial(_affine_act_kernel, activation=activation,
                          neg_slope=neg_slope),
        grid=(N, P),
        in_specs=[
            pl.BlockSpec((None, None, Cout, SP), lambda n, p: (n, p, 0, 0)),
            pl.BlockSpec((Cout, 1), lambda n, p: (0, 0)),
            pl.BlockSpec((Cout, 1), lambda n, p: (0, 0)),
        ],
        out_specs=pl.BlockSpec((None, None, Cout, SP), lambda n, p: (n, p, 0, 0)),
        out_shape=jax.ShapeDtypeStruct((N, P, Cout, SP), jnp.float32),
        compiler_params=cparams,
    )(conv, scale2, shift2)

    # ---- depth-to-space (pixel shuffle) back to NCHW ------------------------
    out = out_ph.reshape(N, s, s, Cout, OHp, OWp)
    out = jnp.transpose(out, (0, 3, 4, 1, 5, 2)).reshape(N, Cout, OH, OW)
    return out


# ---------------------------------------------------------------------------
# Pure-JAX (XLA) reference matching the PyTorch forward
# ---------------------------------------------------------------------------
def reference(x, weight, bias, gamma, beta, *, stride, padding, output_padding,
              dilation, batch_norm, activation, eps=1e-5, neg_slope=0.1):
    K = weight.shape[2]
    p_lo = dilation * (K - 1) - padding
    p_hi = p_lo + output_padding
    w_rot = jnp.transpose(weight[:, :, ::-1, ::-1], (1, 0, 2, 3))  # OIHW
    y = lax.conv_general_dilated(
        x, w_rot, window_strides=(1, 1),
        padding=[(p_lo, p_hi), (p_lo, p_hi)],
        lhs_dilation=(stride, stride), rhs_dilation=(dilation, dilation),
        dimension_numbers=('NCHW', 'OIHW', 'NCHW'),
        precision=lax.Precision.HIGHEST)
    y = y + bias[None, :, None, None]
    if batch_norm:
        mean = y.mean(axis=(0, 2, 3), keepdims=True)
        var = ((y - mean) ** 2).mean(axis=(0, 2, 3), keepdims=True)
        y = (y - mean) / jnp.sqrt(var + eps)
        y = y * gamma[None, :, None, None] + beta[None, :, None, None]
    if activation:
        y = jnp.where(y > 0, y, neg_slope * y)
    return y


if __name__ == "__main__":
    # Deconv2DNorm(in_channels=4, out_channels=8, kernel_size=4, stride=2,
    #              padding=1, batch_norm=True, activation=True)
    N, Cin, H, W = 2, 4, 16, 16
    Cout, K = 8, 4
    stride, padding, output_padding, dilation = 2, 1, 0, 1

    key = jax.random.PRNGKey(0)
    kx, kw = jax.random.split(key)
    x = jax.random.normal(kx, (N, Cin, H, W), jnp.float32)

    # kaiming_normal_(weight, a=0.1): for ConvTranspose2d weight [Cin,Cout,K,K],
    # fan_in = Cout*K*K.  constant_(bias, 0); BN weight=1, bias=0.
    gain = (2.0 / (1.0 + 0.1 ** 2)) ** 0.5
    std = gain / (Cout * K * K) ** 0.5
    weight = jax.random.normal(kw, (Cin, Cout, K, K), jnp.float32) * std
    bias = jnp.zeros((Cout,), jnp.float32)
    gamma = jnp.ones((Cout,), jnp.float32)
    beta = jnp.zeros((Cout,), jnp.float32)

    out = deconv2d_norm(x, weight, bias, gamma, beta, stride=stride,
                        padding=padding, output_padding=output_padding,
                        dilation=dilation, batch_norm=True, activation=True)
    out = jax.block_until_ready(out)
    assert out.shape == (N, Cout, 32, 32), out.shape

    # Tight check against a precision-matched reference (bf16-quantized conv
    # inputs, f32 everywhere else — same math the MXU performs).
    xq = x.astype(jnp.bfloat16).astype(jnp.float32)
    wq = weight.astype(jnp.bfloat16).astype(jnp.float32)
    ref_q = reference(xq, wq, bias, gamma, beta, stride=stride, padding=padding,
                      output_padding=output_padding, dilation=dilation,
                      batch_norm=True, activation=True)
    err_q = float(jnp.max(jnp.abs(out - ref_q)))
    assert jnp.allclose(out, ref_q, atol=2e-3, rtol=2e-3), err_q

    # Looser sanity check against the full-f32 reference (bf16 input tolerance).
    ref = reference(x, weight, bias, gamma, beta, stride=stride, padding=padding,
                    output_padding=output_padding, dilation=dilation,
                    batch_norm=True, activation=True)
    err = float(jnp.max(jnp.abs(out - ref)))
    assert jnp.allclose(out, ref, atol=2e-2, rtol=2e-2), err

    print("KERNEL_OK")
</pallas_src>

<mosaic_0001>
module attributes {stable_mosaic.version = 11 : i64} {
  func.func @_conv_phase_kernel(%arg0: i32, %arg1: i32, %arg2: memref<1x1x16x256xbf16, #tpu.memory_space<vmem>>, %arg3: memref<1x8x16xbf16, #tpu.memory_space<vmem>>, %arg4: memref<1x1x8x256xf32, #tpu.memory_space<vmem>>, %arg5: memref<1x1x8x2xf32, #tpu.memory_space<vmem>>) attributes {dimension_semantics = [#tpu.dimension_semantics<parallel>, #tpu.dimension_semantics<parallel>], iteration_bounds = array<i64: 2, 4>, scalar_prefetch = 0 : i64, scratch_operands = 0 : i64, tpu.core_type = #tpu.core_type<tc>, window_params = [{transform_indices = @transform_0, window_bounds = array<i64: 1, 1, 16, 256>}, {transform_indices = @transform_1, window_bounds = array<i64: 1, 8, 16>}, {transform_indices = @transform_2, window_bounds = array<i64: 1, 1, 8, 256>}, {transform_indices = @transform_3, window_bounds = array<i64: 1, 1, 8, 2>}]} {
    %c0 = arith.constant 0 : index
    %c0_0 = arith.constant 0 : index
    %c0_1 = arith.constant 0 : index
    %0 = vector.load %arg3[%c0, %c0_0, %c0_1] : memref<1x8x16xbf16, #tpu.memory_space<vmem>>, vector<1x8x16xbf16>
    %1 = vector.shape_cast %0 : vector<1x8x16xbf16> to vector<8x16xbf16>
    %c0_2 = arith.constant 0 : index
    %c0_3 = arith.constant 0 : index
    %c0_4 = arith.constant 0 : index
    %c0_5 = arith.constant 0 : index
    %2 = vector.load %arg2[%c0_2, %c0_3, %c0_4, %c0_5] : memref<1x1x16x256xbf16, #tpu.memory_space<vmem>>, vector<1x1x16x256xbf16>
    %3 = vector.shape_cast %2 : vector<1x1x16x256xbf16> to vector<16x256xbf16>
    %cst = arith.constant dense<0.000000e+00> : vector<8x256xf32>
    %4 = tpu.matmul %1, %3, %cst {dimension_numbers = #tpu.dot_dimension_numbers<[1], [0], [0], [1], [0, 0, 1, 1], [], []>} : vector<8x16xbf16>, vector<16x256xbf16>, vector<8x256xf32> -> vector<8x256xf32>
    %c0_6 = arith.constant 0 : index
    %c0_7 = arith.constant 0 : index
    %c0_8 = arith.constant 0 : index
    %c0_9 = arith.constant 0 : index
    %5 = vector.load %arg4[%c0_6, %c0_7, %c0_8, %c0_9] : memref<1x1x8x256xf32, #tpu.memory_space<vmem>>, vector<1x1x8x256xf32>
    %6 = vector.shape_cast %5 : vector<1x1x8x256xf32> to vector<8x256xf32>
    %7 = vector.shape_cast %4 : vector<8x256xf32> to vector<1x1x8x256xf32>
    tpu.vector_store %arg4[%c0_6, %c0_7, %c0_8, %c0_9], %7 {strides = array<i32>} : memref<1x1x8x256xf32, #tpu.memory_space<vmem>>, vector<1x1x8x256xf32>,
    %cst_10 = arith.constant dense<0.000000e+00> : vector<8xf32>
    %8 = vector.multi_reduction <add>, %4, %cst_10 [1] : vector<8x256xf32> to vector<8xf32>
    %9 = vector.shape_cast %8 : vector<8xf32> to vector<8x1xf32>
    %10 = arith.mulf %4, %4 : vector<8x256xf32>
    %cst_11 = arith.constant dense<0.000000e+00> : vector<8xf32>
    %11 = vector.multi_reduction <add>, %10, %cst_11 [1] : vector<8x256xf32> to vector<8xf32>
    %12 = vector.shape_cast %11 : vector<8xf32> to vector<8x1xf32>
    %13 = tpu.concatenate %9, %12 in 1 : vector<8x1xf32>, vector<8x1xf32> -> vector<8x2xf32>
    %c0_12 = arith.constant 0 : index
    %c0_13 = arith.constant 0 : index
    %c0_14 = arith.constant 0 : index
    %c0_15 = arith.constant 0 : index
    %14 = vector.load %arg5[%c0_12, %c0_13, %c0_14, %c0_15] : memref<1x1x8x2xf32, #tpu.memory_space<vmem>>, vector<1x1x8x2xf32>
    %15 = vector.shape_cast %14 : vector<1x1x8x2xf32> to vector<8x2xf32>
    %16 = vector.shape_cast %13 : vector<8x2xf32> to vector<1x1x8x2xf32>
    tpu.vector_store %arg5[%c0_12, %c0_13, %c0_14, %c0_15], %16 {strides = array<i32>} : memref<1x1x8x2xf32, #tpu.memory_space<vmem>>, vector<1x1x8x2xf32>,
    return
  }
  func.func @transform_0(%arg0: i32, %arg1: i32) -> (i32, i32, i32, i32) {
    %c0_i32 = arith.constant 0 : i32
    %c0_i32_0 = arith.constant 0 : i32
    %c0_i32_1 = arith.constant 0 : i32
    return %arg0, %arg1, %c0_i32, %c0_i32_0 : i32, i32, i32, i32
  }
  func.func @transform_1(%arg0: i32, %arg1: i32) -> (i32, i32, i32) {
    %c0_i32 = arith.constant 0 : i32
    %c0_i32_0 = arith.constant 0 : i32
    %c0_i32_1 = arith.constant 0 : i32
    return %arg1, %c0_i32, %c0_i32_0 : i32, i32, i32
  }
  func.func @transform_2(%arg0: i32, %arg1: i32) -> (i32, i32, i32, i32) {
    %c0_i32 = arith.constant 0 : i32
    %c0_i32_0 = arith.constant 0 : i32
    %c0_i32_1 = arith.constant 0 : i32
    return %arg0, %arg1, %c0_i32, %c0_i32_0 : i32, i32, i32, i32
  }
  func.func @transform_3(%arg0: i32, %arg1: i32) -> (i32, i32, i32, i32) {
    %c0_i32 = arith.constant 0 : i32
    %c0_i32_0 = arith.constant 0 : i32
    %c0_i32_1 = arith.constant 0 : i32
    return %arg0, %arg1, %c0_i32, %c0_i32_0 : i32, i32, i32, i32
  }
}

</mosaic_0001>

<bundles_post_ra>
// kernel: tpu_custom_call.1
= control target key start
LH: loop header
LB: loop body
LE: loop exit
PB: predicated region body
PF: predicated region fallthrough
CT: control target
= control target key end

     0   :  { %s1168_s0 = inlined_call_operand.hbm [shape: bf16[2,4,16,256], index: 0, kind: input, shape index: {}]   ;;  %s1169_s1 = inlined_call_operand.hbm [shape: bf16[4,8,16], index: 1, kind: input, shape index: {}]   ;;  %s1170_s2 = inlined_call_operand.hbm [shape: f32[2,4,8,256], index: 2, kind: output, shape index: {0}]   ;;  %s1171_s3 = inlined_call_operand.vmem [shape: f32[2,4,8,2], index: 3, kind: output, shape index: {1}]  }
   0x1   :  { %1182 = sst [smem:[#allocation14_spill]] %s1171_s3 }
   0x2   :  { %9 = vsyncpa [#allocation3], 0 }
   0x3   :  { %11 = vsyncpa [#allocation3 + $0x1], 0 }
   0x4   :  { %12 = vsyncpa [#allocation6], 0 }
   0x5   :  { %14 = vsyncpa [#allocation6 + $0x1], 0 }
   0x6   :  { %15 = vsyncpa [#allocation4], 0 }
   0x7   :  { %17 = vsyncpa [#allocation4 + $0x1], 0  ;;  %s864_s12 = smov 0   ;;  %s866_s13 = smov 0  }
   0x8   :  { %s868_s14 = smov 0   ;;  %s870_s15 = smov 0  }
   0x9   :  { %s872_s16 = smov 0   ;;  %s874_s17 = smov 0  }
   0xa   :  { %s876_s18 = smov 0   ;;  %s878_s19 = smov 0  }
   0xb   :  { %s880_s20 = smov 0   ;;  %s882_s21 = smov 0  }
   0xc   :  { %s884_s22 = smov 0  }
   0xd LB: > { %s513_s23 = sadd.s32 4294967294, %s836_s22   ;;  %s32_s24 = sadd.s32 1, %s828_s20  ;;  %s836_s22 = sphi %s884_s22, %s23_s22   ;;  %s832_s21 = sphi %s882_s21, %s1216_s21   ;;  %s828_s20 = sphi %s880_s20, %s1215_s20   ;;  %s824_s19 = sphi %s878_s19, %s1214_s19   ;;  %s820_s18 = sphi %s876_s18, %s1213_s18   ;;  %s816_s17 = sphi %s874_s17, %s1212_s17   ;;  %s812_s16 = sphi %s872_s16, %s1211_s16   ;;  %s808_s15 = sphi %s870_s15, %s1210_s15   ;;  %s804_s14 = sphi %s868_s14, %s1209_s14   ;;  %s800_s13 = sphi %s866_s13, %s1208_s13   ;;  %s796_s12 = sphi %s864_s12, %s1207_s12  }
   0xe   : > { %p33_p0 = scmp.ge.s32.totalorder %s32_s24, 4  ;;  %s35_s25 = sadd.s32 1, %s832_s21 }
   0xf   : > { %s44_s26 = sadd.s32 1, %s816_s17  ;;  %p1176_p1 = scmp.ne.s32.totalorder %s816_s17, %s812_s16 }
  0x10   : > { %s1218_s24 = smov (%p33_p0, %s32_s24), 0  ;;  %s1220_s25 = smov (!%p33_p0, %s35_s25), %s832_s21 }
  0x11   : > { %1183 = sst [smem:[#allocation11_spill]] %s1218_s24  ;;  %s930_s27 = ssub.s32 %s828_s20, %s1218_s24 }
  0x12   : > { %p1177_p2 = scmp.eq.s32.totalorder %s836_s22, 0  ;;  %p37_p3 = scmp.ge.s32.totalorder %s1220_s25, 2 }
  0x13   : > { %p1178_p4 = scmp.ne.s32.totalorder %s812_s16, %s808_s15  ;;  %p115_p6 = scmp.eq.s32.totalorder %s513_s23, 7 }
  0x14   : > { %p940_p5 = por %p1177_p2, %p1176_p1  ;;  %s1222_s25 = smov (%p37_p3, %s1220_s25), 0 }
  0x15   : > { %1185 = sst [smem:[#allocation12_spill]] %s1222_s25  ;;  %p949_p7 = por %p115_p6, %p1178_p4 }
  0x16   : > { %s39_s30 = ssub.s32 %s832_s21, %s1222_s25  ;;  %p1175_p8 = scmp.lt.s32.totalorder %s836_s22, 8 }
  0x17   : > { %s1186_s29 = scalar_select %p949_p7, 1, 0 }
  0x18   : > { %s41_s4 = sor.u32 %s930_s27, %s39_s30  ;;  %s163_s5 = sand.u32 1, %s816_s17  }
  0x19   : > { %1187 = sst [smem:[#allocation13_spill]] %s1186_s29  ;;  %p42_p9 = scmp.eq.s32.totalorder %s41_s4, 0 }
  0x1a   : > { %s516_s6 = sshll.u32 %s163_s5, 4  ;;  %s517_s7 = sshll.u32 %s828_s20, 2 }
  0x1b   : > { %s960_s8 = scalar_select %p42_p9, %s816_s17, %s44_s26  }
  0x1c   : > { %s518_s9 = sshll.u32 %s832_s21, 4  ;;  %s167_s11 = scalar_lea.vmem [#allocation2], %s516_s6 }
  0x1d   : > { %s173_s10 = sadd.s32 %s518_s9, %s517_s7  ;;  %s176_s23 = sshll.u32 %s167_s11, 4  ;;  %s963_s23 = int_to_ptr.vmem [resolvable:$true] %s176_s23 }
  0x1e   : > { %s519_s24 = sshll.u32 %s173_s10, 6  ;;  %p974_p10 = pnand %p1175_p8, %p940_p5 }
  0x1f   : > { %s968_s25 = scalar_lea.hbm %s1168_s0, %s519_s24  ;;  %s979_s30 = scalar_lea.sflag [#allocation3], %s163_s5 }
  0x20   : > { %s650_s4 = scalar_lea.hbm %s968_s25, 256  ;;  %p652_p13 = pneg %p974_p10 }
  0x21   : > { %p651_p12 = scmp.ne.s32.totalorder %s968_s25, %s650_s4  ;;  %s655_s28 = scalar_lea.hbm %s1168_s0, 2048 }
  0x22   : > { %p656_p5 = scmp.lt.u32.totalorder %s968_s25, %s1168_s0  ;;  %p657_p6 = scmp.lt.u32.totalorder %s655_s28, %s650_s4 }
  0x23   : > { %p653_p0 = pnand %p652_p13, %p651_p12  ;;  %p659_p8 = scmp.lt.u32.totalorder %s650_s4, %s968_s25 }
  0x24   : > { %p658_p9 = por %p657_p6, %p656_p5 }
  0x25   : > { %p654_p3 = pneg %p653_p0 }
  0x26   : > { %p660_p1 = por %p659_p8, %p658_p9 }
  0x28   : > { %p661_p2 = pnand %p660_p1, %p654_p3 }
  0x2a   : > { %664 = shalt.err (!%p661_p2)
}
  0x2b   : > { %s665_s5 = scalar_lea.vmem %s963_s23, 256  ;;  %s838_s7 = smov [#allocation2]  }
  0x2c   : > { %p666_p12 = scmp.ne.s32.totalorder %s963_s23, %s665_s5  ;;  %s670_s9 = sshll.u32 %s838_s7, 4  ;;  %s671_s9 = int_to_ptr.vmem [resolvable:$false] %s670_s9 }
  0x2d   : > { %s672_s10 = scalar_lea.vmem %s671_s9, 512  ;;  %p673_p11 = scmp.lt.s32.totalorder %s963_s23, %s671_s9 }
  0x2e   : > { %p668_p0 = pnand %p666_p12, %p652_p13  ;;  %p674_p5 = scmp.lt.s32.totalorder %s672_s10, %s665_s5 }
  0x30   : > { %p669_p4 = pneg %p668_p0  ;;  %p675_p6 = por %p674_p5, %p673_p11 }
  0x32   : > { %p676_p8 = pnand %p675_p6, %p669_p4 }
  0x34   : > { %679 = shalt.err (!%p676_p8)
}
  0x35   : > { %s839_s11 = smov 128   ;;  %s840_s4 = smov 8  }
  0x36   : > { %546 = dma.hbm_to_vmem [thread:$0]  (!%p974_p10), %s968_s25, 256, %s963_s23, %s979_s30, %s839_s11, %s839_s11, %s840_s4  }
  0x37   : > { %p202_p1 = scmp.lt.s32.totalorder %s836_s22, 9  ;;  %p1189_p2 = scmp.ge.s32.totalorder %s836_s22, 1 }
  0x38   : > { %s512_s24 = sadd.s32 4294967295, %s836_s22   ;;  %p68_p11 = scmp.eq.s32.totalorder %s930_s27, 0 }
  0x39   : > { %p1010_p4 = pnand %p1189_p2, %p202_p1  ;;  %p58_p13 = scmp.eq.s32.totalorder %s512_s24, 0 }
  0x3a   : > { %s70_s28 = sadd.s32 1, %s804_s14  ;;  %p1191_p3 = scmp.ne.s32.totalorder %s812_s16, %s808_s15 }
  0x3b   : > { %s1018_s29 = scalar_select %p68_p11, %s804_s14, %s70_s28  }
  0x3c   : > { %p1023_p9 = por %p58_p13, %p1191_p3  ;;  %p77_p10 = scmp.ne.s32.totalorder %s804_s14, %s800_s13 }
  0x3d   : > { %p83_p12 = scmp.ne.s32.totalorder %s800_s13, %s796_s12  ;;  %p109_p0 = scmp.eq.s32.totalorder %s512_s24, 7 }
  0x3e   : > { %s1192_s26 = scalar_select %p1023_p9, 1, 0 }
  0x3f   : > { %p1193_p5 = scmp.eq.s32.totalorder %s836_s22, 0  ;;  %s186_s25 = sand.u32 1, %s804_s14  }
  0x40   : > { %p1034_p8 = por %p83_p12, %p58_p13  ;;  %p1195_p1 = scmp.ne.s32.totalorder %s816_s17, %s812_s16 }
  0x41   : > { %p79_p6 = por %p77_p10, %p1193_p5  ;;  %s520_s30 = sshll.u32 %s186_s25, 2 }
  0x42   : > { %s1194_s23 = scalar_select %p1034_p8, 1, 0 }
  0x43   : > { %p1041_p2 = por %p109_p0, %p1195_p1  ;;  %s521_s6 = sshll.u32 %s828_s20, 6 }
  0x44   : > { %s1049_s9 = scalar_lea.hbm %s1169_s1, %s521_s6  ;;  %s190_s12 = scalar_lea.vmem [#allocation5], %s520_s30 }
  0x45   : > { %s1196_s27 = scalar_select %p1041_p2, 1, 0 }
  0x46   : > { %s197_s10 = sshll.u32 %s190_s12, 4  ;;  %p1197_p11 = scmp.lt.s32.totalorder %s836_s22, 8  ;;  %s1051_s10 = int_to_ptr.vmem [resolvable:$true] %s197_s10 }
  0x47   : > { %s187_s4 = scalar_lea.sflag [#allocation6], %s186_s25  ;;  %s680_s24 = scalar_lea.hbm %s1049_s9, 64 }
  0x48   : > { %p1055_p13 = pnand %p1197_p11, %p79_p6  ;;  %p681_p3 = scmp.ne.s32.totalorder %s1049_s9, %s680_s24 }
  0x49   : > { %s685_s6 = scalar_lea.hbm %s1169_s1, 256  ;;  %p686_p5 = scmp.lt.u32.totalorder %s1049_s9, %s1169_s1 }
  0x4a   : > { %p682_p10 = pneg %p1055_p13  ;;  %p687_p6 = scmp.lt.u32.totalorder %s685_s6, %s680_s24 }
  0x4b   : > { %p689_p11 = scmp.lt.u32.totalorder %s680_s24, %s1049_s9 }
  0x4c   : > { %p683_p12 = pnand %p682_p10, %p681_p3  ;;  %p688_p1 = por %p687_p6, %p686_p5 }
  0x4e   : > { %p684_p0 = pneg %p683_p12  ;;  %p690_p7 = por %p689_p11, %p688_p1 }
  0x50   : > { %p691_p2 = pnand %p690_p7, %p684_p0 }
  0x52   : > { %694 = shalt.err (!%p691_p2)
}
  0x53   : > { %s695_s25 = scalar_lea.vmem %s1051_s10, 64  ;;  %s841_s12 = smov [#allocation5]  }
  0x54   : > { %p696_p3 = scmp.ne.s32.totalorder %s1051_s10, %s695_s25  ;;  %s700_s28 = sshll.u32 %s841_s12, 4  ;;  %s701_s28 = int_to_ptr.vmem [resolvable:$false] %s700_s28 }
  0x55   : > { %s702_s30 = scalar_lea.vmem %s701_s28, 128  ;;  %p703_p9 = scmp.lt.s32.totalorder %s1051_s10, %s701_s28 }
  0x56   : > { %p698_p12 = pnand %p696_p3, %p682_p10  ;;  %p704_p5 = scmp.lt.s32.totalorder %s702_s30, %s695_s25 }
  0x58   : > { %p699_p8 = pneg %p698_p12  ;;  %p705_p6 = por %p704_p5, %p703_p9 }
  0x5a   : > { %p706_p1 = pnand %p705_p6, %p699_p8 }
  0x5c   : > { %709 = shalt.err (!%p706_p1)
}
  0x5d   : > { %549 = dma.hbm_to_vmem [thread:$0]  (!%p1055_p13), %s1049_s9, 64, %s1051_s10, %s187_s4  }
  0x5e   : > { %206 = sbr.rel (%p1010_p4) target bundleno = 474 (0x1da), region = 28  ;;  %s1087_s24 = sand.u32 (!%p1010_p4), 1, %s812_s16  }
  0x5f   : > { %s523_s6 = sshll.u32 (!%p1010_p4), %s1087_s24, 4  ;;  %s209_s5 = scalar_lea.sflag (!%p1010_p4), [#allocation3], %s1087_s24 }
  0x60   : > { %s212_s7 = scalar_lea.vmem (!%p1010_p4), [#allocation2], %s523_s6  ;;  %p1199_p7 = scmp.ne.s32.totalorder (!%p1010_p4), %s1192_s26, 0 }
  0x65   : > { %783 = dma.done.wait (%p1199_p7), %s209_s5, 256  }
  0x66   : > { %785 = vsyncadd (%p1199_p7), %s209_s5, 4294967040  ;;  %s217_s9 = sand.u32 1, %s800_s13   ;;  %p1200_p4 = scmp.ne.s32.totalorder %s1194_s23, 0 }
  0x67   : > { %s524_s10 = sshll.u32 %s217_s9, 2  ;;  %s218_s3 = scalar_lea.sflag [#allocation6], %s217_s9 }
  0x68   : > { %s221_s11 = scalar_lea.vmem [#allocation5], %s524_s10 }
  0x69   : > { %787 = dma.done.wait (%p1200_p4), %s218_s3, 64  }
  0x6a   : > { %789 = vsyncadd (%p1200_p4), %s218_s3, 4294967232  ;;  %v842_v0 = vmov 0   ;;  %v647_v1 = vld [vmem:[%s212_s7 + $0x4] ss:$8 sps:$4 sm:$0xff]   ;;  %v649_v2 = vld [vmem:[%s212_s7] ss:$8 sps:$4 sm:$0xff]  }
  0x6b   : > { %315 = vmatprep.mubr.bf16.mxu0 %v842_v0  ;;  %283 = vmatprep.subr.bf16.mxu0 %v647_v1  ;;  %v266_v3 = vld [vmem:[%s221_s11] sm:$0xf]  ;;  %vm279_vm0 = vcmask 130048   ;;  %s246_s26 = scalar_lea.vmem [#allocation7], %s523_s6  ;;  %s532_s4 = sshll.u32 %s820_s18, 1 }
  0x6c   : > { %284 = vmatpush1.bf16.msra.mxu0 %v649_v2  ;;  %s363_s23 = sshll.u32 %s246_s26, 4  ;;  %s533_s25 = sshll.u32 %s824_s19, 3  ;;  %s1102_s23 = int_to_ptr.vmem [resolvable:$true] %s363_s23 }
  0x6d   : > { %s359_s12 = sadd.s32 %s533_s25, %s532_s4  ;;  %s339_s7 = scalar_lea.sflag [#allocation4], %s1087_s24 }
  0x6e   : > { %s534_s28 = sshll.u32 %s359_s12, 7  ;;  %s710_s9 = scalar_lea.vmem %s1102_s23, 256 }
  0x6f   : > { %530 = vmatmul.mubr.msk.bf16.vlgmr.msra.gmra.mrb[0].mxu0 %vm279_vm0, %v266_v3  ;;  %s361_s5 = scalar_lea.hbm %s1170_s2, %s534_s28  ;;  %p711_p9 = scmp.ne.s32.totalorder %s1102_s23, %s710_s9 }
  0x70   : > { %p1201_p8 = scmp.ne.s32.totalorder %s1196_s27, 0  ;;  %s843_s10 = smov [#allocation7]  }
  0x71   : > { %s714_s3 = sshll.u32 %s843_s10, 4  ;;  %s715_s3 = int_to_ptr.vmem [resolvable:$false] %s714_s3 }
  0x72   : > { %p712_p2 = pnand %p711_p9, %p1201_p8  ;;  %s716_s11 = scalar_lea.vmem %s715_s3, 512 }
  0x73   : > { %p717_p10 = scmp.lt.s32.totalorder %s1102_s23, %s715_s3  ;;  %p718_p0 = scmp.lt.s32.totalorder %s716_s11, %s710_s9 }
  0x74   : > { %p713_p13 = pneg %p712_p2 }
  0x75   : > { %p719_p11 = por %p718_p0, %p717_p10 }
  0x77   : > { %p720_p3 = pnand %p719_p11, %p713_p13 }
 0x142   : > { %v317_v4 = vpop.f32.mrb[0].mxu0 }
 0x143   : > { %324 = vst [vmem:[%s246_s26] sm:$0xff] %v317_v4  ;;  %v319_v5 = vpop.f32.mrb[1].mxu0  ;;  %v329_v6 = vmul.f32 %v317_v4, %v317_v4 }
 0x144   : > { %325 = vst [vmem:[%s246_s26 + $0x8] sm:$0xff] %v319_v5  ;;  %v321_v7 = vpop.f32.mrb[2].mxu0  ;;  %v326_v8 = vadd.f32 %v319_v5, %v317_v4  ;;  %v330_v9 = vmul.f32 %v319_v5, %v319_v5 }
 0x145   : > { %v322_v10 = vpop.f32.mrb[3].mxu0 }
 0x146   : > { %327 = vadd.xlane.f32.xlu0 %v326_v8  ;;  %v331_v11 = vadd.f32 %v330_v9, %v329_v6 }
 0x14a   : > { %332 = vadd.xlane.f32.xlu0 %v331_v11 }
 0x14b   : > { %723 = shalt.err (!%p720_p3)
}
 0x14c   : > { %s724_s26 = scalar_lea.hbm %s361_s5, 256  ;;  %s728_s25 = scalar_lea.hbm %s1170_s2, 2048 }
 0x14d   : > { %p725_p12 = scmp.ne.s32.totalorder %s361_s5, %s724_s26  ;;  %p729_p1 = scmp.lt.u32.totalorder %s361_s5, %s1170_s2 }
 0x14e   : > { %p730_p7 = scmp.lt.u32.totalorder %s728_s25, %s724_s26  ;;  %p732_p9 = scmp.lt.u32.totalorder %s724_s26, %s361_s5 }
 0x14f   : > { %p726_p5 = pnand %p725_p12, %p1201_p8 }
 0x150   : > { %p731_p4 = por %p730_p7, %p729_p1 }
 0x151   : > { %p727_p6 = pneg %p726_p5 }
 0x152   : > { %p733_p2 = por %p732_p9, %p731_p4 }
 0x154   : > { %p734_p13 = pnand %p733_p2, %p727_p6 }
 0x156   : > { %737 = shalt.err (!%p734_p13)
}
 0x157   : > { %541 = dma.vmem_to_hbm [thread:$0]  (%p1201_p8), %s1102_s23, 256, %s361_s5, %s339_s7   ;;  %vm334_vm1 = vcmask 7168   ;;  %vm336_vm2 = vcmask 15360  }
 0x158   : > { %p257_p10 = scmp.lt.s32.totalorder %s824_s19, 1  ;;  %p259_p0 = scmp.lt.s32.totalorder %s820_s18, 3 }
 0x159   : > { %s1202_s11 = sld [smem:[#allocation14_spill]] }
 0x15a   : > { %s1224_s19 = smov (!%p257_p10, %s824_s19), 1  ;;  %s1226_s18 = smov (!%p259_p0, %s820_s18), 3 }
 0x15b   : > { %s526_s30 = sshll.u32 %s1224_s19, 2 }
 0x15c   : > { %s262_s6 = sadd.s32 %s526_s30, %s1226_s18 }
 0x15d   : > { %s527_s9 = sshll.u32 %s262_s6, 3 }
 0x15f   : > { %s264_s26 = scalar_lea.vmem %s1202_s11, %s527_s9 }
 0x1d3   : > { %v328_v12 = vpop.xlane.xlu0 %327 }
 0x1d7   : > { %v333_v13 = vpop.xlane.xlu0 %332 }
 0x1d8   : > { %v335_v14 = vsel %vm334_vm1, %v328_v12, %v333_v13 }
 0x1d9   : > { %337 = vst.msk [vmem:[%s264_s26] sm:$0xff] %vm336_vm2, %v335_v14 }
 0x1da PF: > { %s1203_s27 = sld [smem:[#allocation13_spill]]  ;;  %p555_p8 = scmp.ge.s32.totalorder %s836_s22, 2 }
 0x1db   : > { %s378_s23 = sand.u32 1, %s808_s15  }
 0x1dc   : > { %s379_s18 = scalar_lea.sflag [#allocation4], %s378_s23 }
 0x1e0   : > { %p1204_p11 = scmp.ne.s32.totalorder %s1203_s27, 0 }
 0x1e2   : > { %p551_p3 = pnand %p555_p8, %p1204_p11 }
 0x1e4   : > { %791 = dma.done.wait (!%p551_p3), %s379_s18, 256  }
 0x1e5   : > { %793 = vsyncadd (!%p551_p3), %s379_s18, 4294967040  ;;  %s23_s22 = sadd.s32 1, %s836_s22   ;;  %s1205_s5 = sld [smem:[#allocation11_spill]] }
 0x1e6   : > { %p20_p12 = scmp.ge.s32.totalorder %s23_s22, 10   ;;  %s1206_s7 = sld [smem:[#allocation12_spill]] }
 0x1e7   : > { %s1207_s12 = smov %s800_s13  ;;  %s1208_s13 = smov %s804_s14 }
 0x1e8   : > { %s1209_s14 = smov %s1018_s29  ;;  %s1210_s15 = smov %s812_s16 }
 0x1e9   : > { %s1211_s16 = smov %s816_s17  ;;  %s1212_s17 = smov %s960_s8 }
 0x1ea   : > { %s1213_s18 = smov %s828_s20  ;;  %s1214_s19 = smov %s832_s21 }
 0x1eb   : > { %s1215_s20 = smov %s1205_s5  ;;  %22 = sbr.rel (!%p20_p12) target bundleno = 13 (0xd), region = 98 }
 0x1ec   : > { %s1216_s21 = smov %s1206_s7 }
 0x1f2   :  { %395 = vsyncpa [#allocation3], 1 }
 0x1f3   :  { %397 = vsyncpa [#allocation3 + $0x1], 1 }
 0x1f4   :  { %398 = vsyncpa [#allocation6], 1 }
 0x1f5   :  { %400 = vsyncpa [#allocation6 + $0x1], 1 }
 0x1f6   :  { %401 = vsyncpa [#allocation4], 1 }
 0x1f7   :  { %403 = vsyncpa [#allocation4 + $0x1], 1 }

</bundles_post_ra>
